<compile_context>
chip_gen: v5e
topology: v5e:2x2
jax: 0.10.0
libtpu: 0.0.40
codegen_flags: <defaults>
</compile_context>

<pallas_src>
import functools

import jax
import jax.numpy as jnp
from jax import lax
from jax.experimental import pallas as pl
from jax.experimental.pallas import tpu as pltpu


def _gatv2_kernel(x_ref, ea_ref, ei_ref, wlr_ref, blr_ref, we_ref,
                  atth_ref, hsel_ref, bias_ref, out_ref):
    """One graph per grid step. Shapes (leading batch dim squeezed away):

      x        [N, D]       ea       [E, D]      ei (int32)  [2, E]
      wlr      [D, 2*HC]    blr      [1, 2*HC]   we          [D, HC]
      atth     [H, HC]      hsel     [H, HC]     bias        [1, HC]
      out      [N, HC]
    """
    negative_slope = 0.2
    NEG = -1e30
    f32 = jnp.float32

    x = x_ref[...]
    ea = ea_ref[...]
    N = x.shape[0]
    E = ea.shape[0]
    HC = we_ref.shape[1]

    # ---- fused lin_l / lin_r and lin_edge (MXU) -------------------------
    xlr = jnp.dot(x, wlr_ref[...], preferred_element_type=f32) + blr_ref[...]
    xl = xlr[:, :HC]           # lin_l(x)
    xr = xlr[:, HC:]           # lin_r(x)
    ep = jnp.dot(ea, we_ref[...], preferred_element_type=f32)          # [E, HC]

    # ---- build gather/scatter masks in-kernel from edge_index ----------
    node_iota = lax.broadcasted_iota(jnp.int32, (N, E), 0)
    src_b = node_iota == ei_ref[0:1, :]      # [N, E] bool, src_b[n,e] = (src[e]==n)
    dst_b = node_iota == ei_ref[1:2, :]      # [N, E] bool
    src_f = src_b.astype(f32)
    dst_f = dst_b.astype(f32)

    ct0 = (((0,), (0,)), ((), ()))           # contract leading dims  (A^T @ B)
    ct1 = (((1,), (1,)), ((), ()))           # contract trailing dims (A @ B^T)

    # ---- per-edge gathers (transposed contractions, no explicit .T) ----
    xl_src = lax.dot_general(src_f, xl, ct0, preferred_element_type=f32)  # [E, HC]
    xr_dst = lax.dot_general(dst_f, xr, ct0, preferred_element_type=f32)  # [E, HC]

    # ---- GATv2 message + leaky_relu ------------------------------------
    m = xl_src + xr_dst + ep
    z = jnp.where(m > 0, m, negative_slope * m)

    # ---- per-head logits, lane-dense [H, E] -----------------------------
    # atth[h, j] = att[j] if head(j)==h else 0  => logits[h,e] = sum_c att*z
    logits = lax.dot_general(atth_ref[...], z, ct1,
                             preferred_element_type=f32)                  # [H, E]

    # ---- segment softmax over edges sharing a target node ---------------
    # E stays on lanes: [H, N, E] masked max instead of [N, E, H].
    masked = jnp.where(dst_b[None, :, :], logits[:, None, :], NEG)        # [H, N, E]
    maxes = jnp.max(masked, axis=2)                                       # [H, N]
    edge_max = jnp.dot(maxes, dst_f, preferred_element_type=f32)          # [H, E]

    p = jnp.exp(logits - edge_max)                                        # [H, E]
    denom = lax.dot_general(p, dst_f, ct1, preferred_element_type=f32)    # [H, N]
    edge_denom = jnp.dot(denom, dst_f, preferred_element_type=f32)        # [H, E]
    # exact reciprocal keeps the 1e-4 match; approx=True is available when a
    # looser tolerance is acceptable (moves the divide fully to the EUP).
    alpha = p * pl.reciprocal(edge_denom, approx=False)                   # [H, E]

    # ---- broadcast alpha over each head's C channels and scatter-add ----
    alpha_full = lax.dot_general(alpha, hsel_ref[...], ct0,
                                 preferred_element_type=f32)              # [E, HC]
    msg = xl_src * alpha_full
    out_ref[...] = jnp.dot(dst_f, msg, preferred_element_type=f32) + bias_ref[...]


def homogeneous_gat_node_forward(x, edge_index, edge_attr, params, *, heads,
                                 flip_edges_for_nodes=False):
    """Equivalent of HomogeneousGatNodeModule.forward: returns the new graph.x.

    Accepts a single graph (x [N,D], edge_index [2,E], edge_attr [E,D]) or a
    batch of graphs with a leading batch dimension.
    """
    squeeze = False
    if x.ndim == 2:
        x = x[None]
        edge_attr = edge_attr[None]
        edge_index = edge_index[None]
        squeeze = True

    B, N, D = x.shape
    E = edge_index.shape[-1]
    C = D // heads
    HC = heads * C

    if flip_edges_for_nodes:
        edge_index = edge_index[:, ::-1, :]          # swap src/dst rows (flip(0))

    # Shared (per-call) parameter packing.
    w_lr = jnp.concatenate([params["wl"], params["wr"]], axis=1)   # [D, 2HC]
    b_lr = jnp.concatenate([params["bl"], params["br"]], axis=1)   # [1, 2HC]
    head_sel = jnp.repeat(jnp.eye(heads, dtype=jnp.float32), C, axis=1)  # [H, HC]
    att_heads = head_sel * params["att"]                           # [H, HC]

    out = pl.pallas_call(
        _gatv2_kernel,
        out_shape=jax.ShapeDtypeStruct((B, N, HC), jnp.float32),
        grid=(B,),
        in_specs=[
            pl.BlockSpec((None, N, D), lambda b: (b, 0, 0)),    # x
            pl.BlockSpec((None, E, D), lambda b: (b, 0, 0)),    # edge_attr
            pl.BlockSpec((None, 2, E), lambda b: (b, 0, 0)),    # edge_index (int32)
            pl.BlockSpec((D, 2 * HC), lambda b: (0, 0)),        # [wl | wr]
            pl.BlockSpec((1, 2 * HC), lambda b: (0, 0)),        # [bl | br]
            pl.BlockSpec((D, HC), lambda b: (0, 0)),            # we
            pl.BlockSpec((heads, HC), lambda b: (0, 0)),        # att per head
            pl.BlockSpec((heads, HC), lambda b: (0, 0)),        # head selector
            pl.BlockSpec((1, HC), lambda b: (0, 0)),            # bias
        ],
        out_specs=pl.BlockSpec((None, N, HC), lambda b: (b, 0, 0)),
        compiler_params=pltpu.CompilerParams(
            dimension_semantics=("parallel",)),
    )(x.astype(jnp.float32), edge_attr.astype(jnp.float32),
      edge_index.astype(jnp.int32),
      w_lr, b_lr, params["we"], att_heads, head_sel, params["bias"])

    return out[0] if squeeze else out


def init_params(key, latent_dimension, heads):
    """Deterministic synthetic parameter init (glorot weights, small biases)."""
    D = latent_dimension
    C = D // heads
    HC = heads * C
    ks = jax.random.split(key, 6)

    def glorot(k, shape):
        limit = (6.0 / (shape[0] + shape[1])) ** 0.5
        return jax.random.uniform(k, shape, jnp.float32, -limit, limit)

    return dict(
        wl=glorot(ks[0], (D, HC)),
        wr=glorot(ks[1], (D, HC)),
        we=glorot(ks[2], (D, HC)),
        bl=0.1 * jax.random.normal(ks[3], (1, HC), jnp.float32),
        br=0.1 * jax.random.normal(ks[4], (1, HC), jnp.float32),
        att=glorot(ks[5], (1, HC)),       # flattened [1, heads, C]
        bias=jnp.zeros((1, HC), jnp.float32),
    )


def gatv2_reference(x, edge_index, edge_attr, params, *, heads,
                    flip_edges_for_nodes=False):
    """Pure-JAX reference mirroring torch_geometric GATv2Conv forward (1 graph)."""
    N, D = x.shape
    C = D // heads
    if flip_edges_for_nodes:
        edge_index = edge_index[::-1]
    src, dst = edge_index[0], edge_index[1]
    xl = (x @ params["wl"] + params["bl"]).reshape(N, heads, C)
    xr = (x @ params["wr"] + params["br"]).reshape(N, heads, C)
    ep = (edge_attr @ params["we"]).reshape(-1, heads, C)
    m = xl[src] + xr[dst] + ep
    z = jnp.where(m > 0, m, 0.2 * m)
    att = params["att"].reshape(1, heads, C)
    logits = (z * att).sum(-1)
    maxes = jax.ops.segment_max(logits, dst, num_segments=N)
    p = jnp.exp(logits - maxes[dst])
    denom = jax.ops.segment_sum(p, dst, num_segments=N)
    alpha = p / denom[dst]
    msg = xl[src] * alpha[:, :, None]
    out = jax.ops.segment_sum(msg, dst, num_segments=N).reshape(N, heads * C)
    return out + params["bias"]


if __name__ == "__main__":
    key = jax.random.PRNGKey(0)
    latent_dimension = 32
    heads = 4
    B, N, E = 4, 16, 48      # N, E multiples of 8 (pad in wrapper for arbitrary graphs)

    k1, k2, k3, k4, k5 = jax.random.split(key, 5)
    x = jax.random.normal(k1, (B, N, latent_dimension), jnp.float32)
    edge_attr = jax.random.normal(k2, (B, E, latent_dimension), jnp.float32)
    src = jax.random.randint(k3, (B, E), 0, N)
    dst = jax.random.randint(k4, (B, E), 0, N)
    edge_index = jnp.stack([src, dst], axis=1).astype(jnp.int32)   # [B, 2, E]
    params = init_params(k5, latent_dimension, heads)

    # Default (no edge flip)
    out = homogeneous_gat_node_forward(x, edge_index, edge_attr, params,
                                       heads=heads, flip_edges_for_nodes=False)
    out = jax.block_until_ready(out)
    assert out.shape == (B, N, latent_dimension), out.shape
    for b in range(B):
        ref = gatv2_reference(x[b], edge_index[b], edge_attr[b], params, heads=heads)
        err = float(jnp.max(jnp.abs(out[b] - ref)))
        assert jnp.allclose(out[b], ref, atol=1e-4, rtol=1e-4), \
            f"graph {b}: max abs err {err}"

    # flip_edges_for_nodes=True path
    out_f = homogeneous_gat_node_forward(x, edge_index, edge_attr, params,
                                         heads=heads, flip_edges_for_nodes=True)
    out_f = jax.block_until_ready(out_f)
    for b in range(B):
        ref_f = gatv2_reference(x[b], edge_index[b], edge_attr[b], params,
                                heads=heads, flip_edges_for_nodes=True)
        err = float(jnp.max(jnp.abs(out_f[b] - ref_f)))
        assert jnp.allclose(out_f[b], ref_f, atol=1e-4, rtol=1e-4), \
            f"flipped graph {b}: max abs err {err}"

    print("KERNEL_OK")
</pallas_src>

<mosaic_0001>
module attributes {stable_mosaic.version = 11 : i64} {
  func.func @_gatv2_kernel(%arg0: i32, %arg1: memref<1x16x32xf32, #tpu.memory_space<vmem>>, %arg2: memref<1x48x32xf32, #tpu.memory_space<vmem>>, %arg3: memref<1x2x48xi32, #tpu.memory_space<vmem>>, %arg4: memref<32x64xf32, #tpu.memory_space<vmem>>, %arg5: memref<1x64xf32, #tpu.memory_space<vmem>>, %arg6: memref<32x32xf32, #tpu.memory_space<vmem>>, %arg7: memref<4x32xf32, #tpu.memory_space<vmem>>, %arg8: memref<4x32xf32, #tpu.memory_space<vmem>>, %arg9: memref<1x32xf32, #tpu.memory_space<vmem>>, %arg10: memref<1x16x32xf32, #tpu.memory_space<vmem>>) attributes {dimension_semantics = [#tpu.dimension_semantics<parallel>], iteration_bounds = array<i64: 4>, scalar_prefetch = 0 : i64, scratch_operands = 0 : i64, tpu.core_type = #tpu.core_type<tc>, window_params = [{transform_indices = @transform_0, window_bounds = array<i64: 1, 16, 32>}, {transform_indices = @transform_1, window_bounds = array<i64: 1, 48, 32>}, {transform_indices = @transform_2, window_bounds = array<i64: 1, 2, 48>}, {pipeline_mode = #tpu.pipeline_mode<synchronous>, transform_indices = @transform_3, window_bounds = array<i64: 32, 64>}, {pipeline_mode = #tpu.pipeline_mode<synchronous>, transform_indices = @transform_4, window_bounds = array<i64: 1, 64>}, {pipeline_mode = #tpu.pipeline_mode<synchronous>, transform_indices = @transform_5, window_bounds = array<i64: 32, 32>}, {pipeline_mode = #tpu.pipeline_mode<synchronous>, transform_indices = @transform_6, window_bounds = array<i64: 4, 32>}, {pipeline_mode = #tpu.pipeline_mode<synchronous>, transform_indices = @transform_7, window_bounds = array<i64: 4, 32>}, {pipeline_mode = #tpu.pipeline_mode<synchronous>, transform_indices = @transform_8, window_bounds = array<i64: 1, 32>}, {transform_indices = @transform_9, window_bounds = array<i64: 1, 16, 32>}]} {
    %c0 = arith.constant 0 : index
    %c0_0 = arith.constant 0 : index
    %c0_1 = arith.constant 0 : index
    %0 = vector.load %arg1[%c0, %c0_0, %c0_1] : memref<1x16x32xf32, #tpu.memory_space<vmem>>, vector<1x16x32xf32>
    %1 = vector.shape_cast %0 : vector<1x16x32xf32> to vector<16x32xf32>
    %c0_2 = arith.constant 0 : index
    %c0_3 = arith.constant 0 : index
    %c0_4 = arith.constant 0 : index
    %2 = vector.load %arg2[%c0_2, %c0_3, %c0_4] : memref<1x48x32xf32, #tpu.memory_space<vmem>>, vector<1x48x32xf32>
    %3 = vector.shape_cast %2 : vector<1x48x32xf32> to vector<48x32xf32>
    %c0_5 = arith.constant 0 : index
    %c0_6 = arith.constant 0 : index
    %4 = vector.load %arg4[%c0_5, %c0_6] : memref<32x64xf32, #tpu.memory_space<vmem>>, vector<32x64xf32>
    %cst = arith.constant dense<0.000000e+00> : vector<16x64xf32>
    %5 = tpu.matmul %1, %4, %cst {dimension_numbers = #tpu.dot_dimension_numbers<[1], [0], [0], [1], [0, 0, 1, 1], [], []>} : vector<16x32xf32>, vector<32x64xf32>, vector<16x64xf32> -> vector<16x64xf32>
    %c0_7 = arith.constant 0 : index
    %c0_8 = arith.constant 0 : index
    %6 = vector.load %arg5[%c0_7, %c0_8] : memref<1x64xf32, #tpu.memory_space<vmem>>, vector<1x64xf32>
    %7 = vector.broadcast %6 : vector<1x64xf32> to vector<16x64xf32>
    %8 = arith.addf %5, %7 : vector<16x64xf32>
    %9 = vector.extract_strided_slice %8 {offsets = [0, 0], sizes = [16, 32], strides = [1, 1]} : vector<16x64xf32> to vector<16x32xf32>
    %10 = vector.extract_strided_slice %8 {offsets = [0, 32], sizes = [16, 32], strides = [1, 1]} : vector<16x64xf32> to vector<16x32xf32>
    %c0_9 = arith.constant 0 : index
    %c0_10 = arith.constant 0 : index
    %11 = vector.load %arg6[%c0_9, %c0_10] : memref<32x32xf32, #tpu.memory_space<vmem>>, vector<32x32xf32>
    %cst_11 = arith.constant dense<0.000000e+00> : vector<48x32xf32>
    %12 = tpu.matmul %3, %11, %cst_11 {dimension_numbers = #tpu.dot_dimension_numbers<[1], [0], [0], [1], [0, 0, 1, 1], [], []>} : vector<48x32xf32>, vector<32x32xf32>, vector<48x32xf32> -> vector<48x32xf32>
    %13 = tpu.iota {dimensions = array<i32: 0>} : vector<16x48xi32>
    %c0_12 = arith.constant 0 : index
    %c0_13 = arith.constant 0 : index
    %c0_14 = arith.constant 0 : index
    %14 = vector.load %arg3[%c0_12, %c0_13, %c0_14] : memref<1x2x48xi32, #tpu.memory_space<vmem>>, vector<1x1x48xi32>
    %15 = vector.shape_cast %14 : vector<1x1x48xi32> to vector<1x48xi32>
    %16 = vector.broadcast %15 : vector<1x48xi32> to vector<16x48xi32>
    %17 = arith.cmpi eq, %13, %16 : vector<16x48xi32>
    %c0_15 = arith.constant 0 : index
    %c1 = arith.constant 1 : index
    %c0_16 = arith.constant 0 : index
    %18 = vector.load %arg3[%c0_15, %c1, %c0_16] : memref<1x2x48xi32, #tpu.memory_space<vmem>>, vector<1x1x48xi32>
    %19 = vector.shape_cast %18 : vector<1x1x48xi32> to vector<1x48xi32>
    %20 = vector.broadcast %19 : vector<1x48xi32> to vector<16x48xi32>
    %21 = arith.cmpi eq, %13, %20 : vector<16x48xi32>
    %22 = arith.extui %17 : vector<16x48xi1> to vector<16x48xi32>
    %23 = arith.sitofp %22 : vector<16x48xi32> to vector<16x48xf32>
    %24 = arith.extui %21 : vector<16x48xi1> to vector<16x48xi32>
    %25 = arith.sitofp %24 : vector<16x48xi32> to vector<16x48xf32>
    %cst_17 = arith.constant dense<0.000000e+00> : vector<48x32xf32>
    %26 = tpu.matmul %23, %9, %cst_17 {dimension_numbers = #tpu.dot_dimension_numbers<[0], [0], [1], [1], [0, 1, 1, 1], [], []>} : vector<16x48xf32>, vector<16x32xf32>, vector<48x32xf32> -> vector<48x32xf32>
    %cst_18 = arith.constant dense<0.000000e+00> : vector<48x32xf32>
    %27 = tpu.matmul %25, %10, %cst_18 {dimension_numbers = #tpu.dot_dimension_numbers<[0], [0], [1], [1], [0, 1, 1, 1], [], []>} : vector<16x48xf32>, vector<16x32xf32>, vector<48x32xf32> -> vector<48x32xf32>
    %28 = arith.addf %26, %27 : vector<48x32xf32>
    %29 = arith.addf %28, %12 : vector<48x32xf32>
    %cst_19 = arith.constant 0.000000e+00 : f32
    %30 = vector.broadcast %cst_19 : f32 to vector<48x32xf32>
    %31 = arith.cmpf ogt, %29, %30 : vector<48x32xf32>
    %cst_20 = arith.constant 2.000000e-01 : f32
    %32 = vector.broadcast %cst_20 : f32 to vector<48x32xf32>
    %33 = arith.mulf %32, %29 : vector<48x32xf32>
    %34 = arith.select %31, %29, %33 : vector<48x32xi1>, vector<48x32xf32>
    %c0_21 = arith.constant 0 : index
    %c0_22 = arith.constant 0 : index
    %35 = vector.load %arg7[%c0_21, %c0_22] : memref<4x32xf32, #tpu.memory_space<vmem>>, vector<4x32xf32>
    %cst_23 = arith.constant dense<0.000000e+00> : vector<4x48xf32>
    %36 = tpu.matmul %35, %34, %cst_23 {dimension_numbers = #tpu.dot_dimension_numbers<[1], [1], [0], [0], [0, 0, 1, 0], [], []>} : vector<4x32xf32>, vector<48x32xf32>, vector<4x48xf32> -> vector<4x48xf32>
    %37 = vector.shape_cast %21 : vector<16x48xi1> to vector<1x16x48xi1>
    %38 = vector.shape_cast %36 : vector<4x48xf32> to vector<4x1x48xf32>
    %cst_24 = arith.constant -1.000000e+30 : f32
    %39 = vector.shape_cast %37 : vector<1x16x48xi1> to vector<1x16x48xi1>
    %40 = vector.broadcast %39 : vector<1x16x48xi1> to vector<4x16x48xi1>
    %41 = vector.shape_cast %38 : vector<4x1x48xf32> to vector<4x1x48xf32>
    %42 = vector.broadcast %41 : vector<4x1x48xf32> to vector<4x16x48xf32>
    %43 = vector.broadcast %cst_24 : f32 to vector<4x16x48xf32>
    %44 = arith.select %40, %42, %43 : vector<4x16x48xi1>, vector<4x16x48xf32>
    %cst_25 = arith.constant dense<0xFF800000> : vector<4x16xf32>
    %45 = vector.multi_reduction <maximumf>, %44, %cst_25 [2] : vector<4x16x48xf32> to vector<4x16xf32>
    %cst_26 = arith.constant dense<0.000000e+00> : vector<4x48xf32>
    %46 = tpu.matmul %45, %25, %cst_26 {dimension_numbers = #tpu.dot_dimension_numbers<[1], [0], [0], [1], [0, 0, 1, 1], [], []>} : vector<4x16xf32>, vector<16x48xf32>, vector<4x48xf32> -> vector<4x48xf32>
    %47 = arith.subf %36, %46 : vector<4x48xf32>
    %48 = math.exp %47 : vector<4x48xf32>
    %cst_27 = arith.constant dense<0.000000e+00> : vector<4x16xf32>
    %49 = tpu.matmul %48, %25, %cst_27 {dimension_numbers = #tpu.dot_dimension_numbers<[1], [1], [0], [0], [0, 0, 1, 0], [], []>} : vector<4x48xf32>, vector<16x48xf32>, vector<4x16xf32> -> vector<4x16xf32>
    %cst_28 = arith.constant dense<0.000000e+00> : vector<4x48xf32>
    %50 = tpu.matmul %49, %25, %cst_28 {dimension_numbers = #tpu.dot_dimension_numbers<[1], [0], [0], [1], [0, 0, 1, 1], [], []>} : vector<4x16xf32>, vector<16x48xf32>, vector<4x48xf32> -> vector<4x48xf32>
    %51 = tpu.reciprocal %50 : vector<4x48xf32> -> vector<4x48xf32>
    %52 = arith.mulf %48, %51 : vector<4x48xf32>
    %c0_29 = arith.constant 0 : index
    %c0_30 = arith.constant 0 : index
    %53 = vector.load %arg8[%c0_29, %c0_30] : memref<4x32xf32, #tpu.memory_space<vmem>>, vector<4x32xf32>
    %cst_31 = arith.constant dense<0.000000e+00> : vector<48x32xf32>
    %54 = tpu.matmul %52, %53, %cst_31 {dimension_numbers = #tpu.dot_dimension_numbers<[0], [0], [1], [1], [0, 1, 1, 1], [], []>} : vector<4x48xf32>, vector<4x32xf32>, vector<48x32xf32> -> vector<48x32xf32>
    %55 = arith.mulf %26, %54 : vector<48x32xf32>
    %cst_32 = arith.constant dense<0.000000e+00> : vector<16x32xf32>
    %56 = tpu.matmul %25, %55, %cst_32 {dimension_numbers = #tpu.dot_dimension_numbers<[1], [0], [0], [1], [0, 0, 1, 1], [], []>} : vector<16x48xf32>, vector<48x32xf32>, vector<16x32xf32> -> vector<16x32xf32>
    %c0_33 = arith.constant 0 : index
    %c0_34 = arith.constant 0 : index
    %57 = vector.load %arg9[%c0_33, %c0_34] : memref<1x32xf32, #tpu.memory_space<vmem>>, vector<1x32xf32>
    %58 = vector.broadcast %57 : vector<1x32xf32> to vector<16x32xf32>
    %59 = arith.addf %56, %58 : vector<16x32xf32>
    %c0_35 = arith.constant 0 : index
    %c0_36 = arith.constant 0 : index
    %c0_37 = arith.constant 0 : index
    %60 = vector.load %arg10[%c0_35, %c0_36, %c0_37] : memref<1x16x32xf32, #tpu.memory_space<vmem>>, vector<1x16x32xf32>
    %61 = vector.shape_cast %60 : vector<1x16x32xf32> to vector<16x32xf32>
    %62 = vector.shape_cast %59 : vector<16x32xf32> to vector<1x16x32xf32>
    tpu.vector_store %arg10[%c0_35, %c0_36, %c0_37], %62 {strides = array<i32>} : memref<1x16x32xf32, #tpu.memory_space<vmem>>, vector<1x16x32xf32>,
    return
  }
  func.func @transform_0(%arg0: i32) -> (i32, i32, i32) {
    %c0_i32 = arith.constant 0 : i32
    %c0_i32_0 = arith.constant 0 : i32
    %c0_i32_1 = arith.constant 0 : i32
    return %arg0, %c0_i32, %c0_i32_0 : i32, i32, i32
  }
  func.func @transform_1(%arg0: i32) -> (i32, i32, i32) {
    %c0_i32 = arith.constant 0 : i32
    %c0_i32_0 = arith.constant 0 : i32
    %c0_i32_1 = arith.constant 0 : i32
    return %arg0, %c0_i32, %c0_i32_0 : i32, i32, i32
  }
  func.func @transform_2(%arg0: i32) -> (i32, i32, i32) {
    %c0_i32 = arith.constant 0 : i32
    %c0_i32_0 = arith.constant 0 : i32
    %c0_i32_1 = arith.constant 0 : i32
    return %arg0, %c0_i32, %c0_i32_0 : i32, i32, i32
  }
  func.func @transform_3(%arg0: i32) -> (i32, i32) {
    %c0_i32 = arith.constant 0 : i32
    %c0_i32_0 = arith.constant 0 : i32
    %c0_i32_1 = arith.constant 0 : i32
    return %c0_i32, %c0_i32_0 : i32, i32
  }
  func.func @transform_4(%arg0: i32) -> (i32, i32) {
    %c0_i32 = arith.constant 0 : i32
    %c0_i32_0 = arith.constant 0 : i32
    %c0_i32_1 = arith.constant 0 : i32
    return %c0_i32, %c0_i32_0 : i32, i32
  }
  func.func @transform_5(%arg0: i32) -> (i32, i32) {
    %c0_i32 = arith.constant 0 : i32
    %c0_i32_0 = arith.constant 0 : i32
    %c0_i32_1 = arith.constant 0 : i32
    return %c0_i32, %c0_i32_0 : i32, i32
  }
  func.func @transform_6(%arg0: i32) -> (i32, i32) {
    %c0_i32 = arith.constant 0 : i32
    %c0_i32_0 = arith.constant 0 : i32
    %c0_i32_1 = arith.constant 0 : i32
    return %c0_i32, %c0_i32_0 : i32, i32
  }
  func.func @transform_7(%arg0: i32) -> (i32, i32) {
    %c0_i32 = arith.constant 0 : i32
    %c0_i32_0 = arith.constant 0 : i32
    %c0_i32_1 = arith.constant 0 : i32
    return %c0_i32, %c0_i32_0 : i32, i32
  }
  func.func @transform_8(%arg0: i32) -> (i32, i32) {
    %c0_i32 = arith.constant 0 : i32
    %c0_i32_0 = arith.constant 0 : i32
    %c0_i32_1 = arith.constant 0 : i32
    return %c0_i32, %c0_i32_0 : i32, i32
  }
  func.func @transform_9(%arg0: i32) -> (i32, i32, i32) {
    %c0_i32 = arith.constant 0 : i32
    %c0_i32_0 = arith.constant 0 : i32
    %c0_i32_1 = arith.constant 0 : i32
    return %arg0, %c0_i32, %c0_i32_0 : i32, i32, i32
  }
}

</mosaic_0001>

<bundles_post_ra>
// kernel: tpu_custom_call.1
= control target key start
LH: loop header
LB: loop body
LE: loop exit
PB: predicated region body
PF: predicated region fallthrough
CT: control target
= control target key end

     0   :  { %14 = vsyncpa [#allocation3], 0  ;;  %s1637_s0 = inlined_call_operand.vmem [shape: f32[4,16,32], index: 0, kind: input, shape index: {}]   ;;  %s1638_s1 = inlined_call_operand.vmem [shape: f32[4,48,32], index: 1, kind: input, shape index: {}]   ;;  %s1639_s2 = inlined_call_operand.vmem [shape: s32[4,2,48], index: 2, kind: input, shape index: {}]   ;;  %s1640_s3 = inlined_call_operand.vmem [shape: f32[32,64], index: 3, kind: input, shape index: {}]   ;;  %s1641_s4 = inlined_call_operand.vmem [shape: f32[1,64], index: 4, kind: input, shape index: {}]   ;;  %s1642_s5 = inlined_call_operand.vmem [shape: f32[32,32], index: 5, kind: input, shape index: {}]   ;;  %s1643_s6 = inlined_call_operand.vmem [shape: f32[4,32], index: 6, kind: input, shape index: {}]   ;;  %s1644_s7 = inlined_call_operand.vmem [shape: f32[4,32], index: 7, kind: input, shape index: {}]   ;;  %s1645_s8 = inlined_call_operand.vmem [shape: f32[1,32], index: 8, kind: input, shape index: {}]   ;;  %s1646_s9 = inlined_call_operand.hbm [shape: f32[4,16,32], index: 9, kind: output, shape index: {}]  }
   0x1   :  { %16 = vsyncpa [#allocation3 + $0x1], 0  ;;  %s1382_s30 = smov 0   ;;  %s1384_s10 = smov 0  }
   0x2   :  { %s1386_s11 = smov 0   ;;  %s1388_s12 = smov 0  }
   0x3 LB: > { %s1403_s13 = sadd.s32 4294967295, %s1325_s12   ;;  %s1138_s14 = sadd.s32 4294967294, %s1325_s12   ;;  %s1325_s12 = sphi %s1388_s12, %s1656_s12   ;;  %s1321_s11 = sphi %s1386_s11, %s1655_s11   ;;  %s1317_s10 = sphi %s1384_s10, %s1654_s10   ;;  %s1313_s30 = sphi %s1382_s30, %s1653_s30  }
   0x4   : > { %s1407_s15 = sadd.s32 1, %s1325_s12   ;;  %s233_s16 = sadd.s32 1, %s1321_s11 }
   0x5   : > { %s230_s17 = ssub.s32 %s1325_s12, %s1407_s15  ;;  %p243_p0 = scmp.ne.s32.totalorder %s1321_s11, %s1317_s10 }
   0x6   : > { %p231_p1 = scmp.eq.s32.totalorder %s230_s17, 0  ;;  %p244_p2 = scmp.eq.s32.totalorder %s1403_s13, 3 }
   0x7   : > { %p249_p3 = scmp.ne.s32.totalorder %s1317_s10, %s1313_s30  ;;  %p250_p4 = scmp.eq.s32.totalorder %s1138_s14, 3 }
   0x8   : > { %s1418_s18 = scalar_select %p231_p1, %s1321_s11, %s233_s16  }
   0x9   : > { %p1420_p5 = por %p244_p2, %p243_p0  ;;  %p1424_p6 = por %p250_p4, %p249_p3 }
   0xa   : > { %p1141_p7 = scmp.ge.s32.totalorder %s1325_s12, 1  ;;  %p309_p8 = scmp.lt.s32.totalorder %s1325_s12, 5 }
   0xc   : > { %p310_p9 = pnand %p1141_p7, %p309_p8 }
   0xd   : > { %p354_p10 = scmp.lt.s32.totalorder (!%p310_p9), %s1403_s13, 3  ;;  %s1328_s29 = smov (!%p310_p9), 96  }
   0xe   : > { %313 = sbr.rel (%p310_p9) target bundleno = 1768 (0x6e8), region = 56  ;;  %s1202_s26 = sshll.u32 (!%p310_p9), %s1403_s13, 4 }
  0x13   : > { %v379_v0 = vld [vmem:[%s1640_s3 + $0x18] sm:$0xff]  ;;  %v378_v1 = vld [vmem:[%s1640_s3 + $0x10] sm:$0xff]  ;;  %v377_v2 = vld [vmem:[%s1640_s3 + $0x8] sm:$0xff]  ;;  %s1441_s27 = scalar_select %p354_p10, %s1403_s13, 3  ;;  %vm384_vm0 = vcmask 261120   ;;  %v471_v7 = vlaneseq  ;;  %v1327_v10 = vmov 0.0  }
  0x14   : > { %403 = vmatpush.msra.mxu0 %v379_v0  ;;  %v376_v3 = vld [vmem:[%s1640_s3] sm:$0xff]  ;;  %vm522_vm5 = vcmask 130048   ;;  %v417_v28 = vld [vmem:[%s1642_s5 + $0x18] sm:$0xff]  ;;  %v416_v29 = vld [vmem:[%s1642_s5 + $0x10] sm:$0xff]  ;;  %vm763_vm12 = vcmask 392192   ;;  %vm801_vm13 = vcmask 130112  }
  0x15   : > { %s1201_s14 = sshll.u32 %s1441_s27, 4  ;;  %s1146_s16 = sshll.u32 %s1441_s27, 1  ;;  %v472_v8 = vshrl.u32 %v471_v7, 7  ;;  %v1256_v13 = vld [vmem:[%s1641_s4] ss:$0 sm:$0xff]  ;;  %448 = vmatpush.msra.mxu1 %v417_v28  ;;  %v415_v30 = vld [vmem:[%s1642_s5 + $0x8] sm:$0xff] }
  0x16   : > { %404 = vmatpush.msra.mxu0 %v378_v1  ;;  %s358_s22 = scalar_lea.vmem %s1637_s0, %s1201_s14  ;;  %s367_s25 = scalar_lea.vmem %s1639_s2, %s1146_s16  ;;  %v414_v32 = vld [vmem:[%s1642_s5] sm:$0xff]  ;;  %vm812_vm14 = vcmask 1041409   ;;  %vm814_vm15 = vcmask 1042434  }
  0x17   : > { %v368_v4 = vld [vmem:[%s358_s22] sm:$0xff]  ;;  %v369_v5 = vld [vmem:[%s358_s22 + $0x8] sm:$0xff]  ;;  %v473_v18 = vadd.s32 8, %v472_v8  ;;  %s1205_s22 = smul.u32 48, %s1441_s27  ;;  %449 = vmatpush.msra.mxu1 %v416_v29  ;;  %s1048_s27 = scalar_lea.hbm %s1646_s9, %s1202_s26 }
  0x18   : > { %405 = vmatpush.msra.mxu0 %v377_v2  ;;  %v1255_v6 = vld [vmem:[%s367_s25 + $0x1] ss:$0 sm:$0xff]  ;;  %v1257_v21 = vld [vmem:[%s367_s25] ss:$0 sm:$0xff]  ;;  %s1051_s17 = sshll.u32 %s1048_s27, 4  ;;  %s1283_s26 = scalar_lea.hbm %s1646_s9, 64  ;;  %s1052_s17 = int_to_ptr.hbm [resolvable:$true] %s1051_s17 }
  0x19   : > { %vm1457_vm1 = vcmp.eq.s32.totalorder %v472_v8, %v1255_v6  ;;  %vm1469_vm2 = vcmp.eq.s32.totalorder %v473_v18, %v1255_v6  ;;  %vm476_vm3 = vcmp.eq.s32.totalorder %v472_v8, %v1257_v21  ;;  %vm477_vm4 = vcmp.eq.s32.totalorder %v473_v18, %v1257_v21  ;;  %s363_s14 = scalar_lea.vmem %s1638_s1, %s1205_s22  ;;  %450 = vmatpush.msra.mxu1 %v415_v30  ;;  %s351_s22 = sand.u32 1, %s1317_s10  }
  0x1a   : > { %406 = vmatpush.msra.mxu0 %v376_v3  ;;  %v1463_v11 = vsel %vm1457_vm1, 1.0, %v1327_v10  ;;  %v1475_v20 = vsel %vm1469_vm2, 1.0, %v1327_v10  ;;  %v1155_v22 = vsel %vm476_vm3, 1.0, %v1327_v10  ;;  %v1156_v23 = vsel %vm477_vm4, 1.0, %v1327_v10  ;;  %v370_v33 = vld [vmem:[%s363_s14] sm:$0xff]  ;;  %v371_v35 = vld [vmem:[%s363_s14 + $0x8] sm:$0xff] }
  0x1b   : > { %1147 = vmatmul.msk.f32.vlgmr.msra.gmra.mxu0 %vm384_vm0, %v368_v4  ;;  %576 = vxpose.xlu1.b32.start [1/2] (short) (narrow) %v1463_v11, 48  ;;  %v372_v37 = vld [vmem:[%s363_s14 + $0x10] sm:$0xff]  ;;  %v373_v40 = vld [vmem:[%s363_s14 + $0x18] sm:$0xff]  ;;  %v374_v43 = vld [vmem:[%s363_s14 + $0x20] sm:$0xff]  ;;  %s1142_s23 = sshll.u32 %s351_s22, 4  ;;  %s1037_s21 = scalar_lea.sflag [#allocation3], %s351_s22 }
  0x1c   : > { %451 = vmatpush.msra.mxu1 %v414_v32  ;;  %v375_v44 = vld [vmem:[%s363_s14 + $0x28] sm:$0xff]  ;;  %v699_v32 = vld [vmem:[%s1643_s6] sm:$0xf]  ;;  %s353_s28 = scalar_lea.vmem [#allocation2], %s1142_s23  ;;  %s1277_s24 = sshra.s32 %s1052_s17, 4  ;;  %s1278_s24 = int_to_ptr.hbm [resolvable:$true] %s1277_s24 }
  0x1d   : > { %1149 = vmatmul.msk.f32.vlgmr.msra.gmra.mxu1 %vm384_vm0, %v370_v33  ;;  %s1049_s16 = sshll.u32 %s353_s28, 4  ;;  %s1279_s13 = scalar_lea.hbm %s1278_s24, 16  ;;  %s1050_s16 = int_to_ptr.vmem [resolvable:$true] %s1049_s16 }
  0x1e   : > { %p1280_p11 = scmp.ne.s32.totalorder %s1278_s24, %s1279_s13  ;;  %p1284_p0 = scmp.lt.s32.totalorder %s1278_s24, %s1646_s9 }
  0x1f   : > { %p1285_p1 = scmp.lt.s32.totalorder %s1283_s26, %s1279_s13 }
  0x20   : > { %p1281_p12 = pnand %p1280_p11, %p1420_p5 }
  0x21   : > { %p1286_p2 = por %p1285_p1, %p1284_p0 }
  0x22   : > { %p1282_p13 = pneg %p1281_p12 }
  0x23   : > { %1148 = vmatmul.msk.f32.gmra.mxu0 %vm384_vm0, %v369_v5  ;;  %577 = vxpose.xlu1.b32.end [2/2] (short) (narrow) %v1475_v20, 48 }
  0x24   : > { %p1287_p3 = pnand %p1286_p2, %p1282_p13 }
  0x25   : > { %1150 = vmatmul.msk.f32.gmra.mxu1 %vm384_vm0, %v371_v35 }
  0x2d   : > { %1151 = vmatmul.msk.f32.gmra.mxu1 %vm384_vm0, %v372_v37 }
  0x35   : > { %1152 = vmatmul.msk.f32.gmra.mxu1 %vm384_vm0, %v373_v40 }
  0x3d   : > { %1153 = vmatmul.msk.f32.gmra.mxu1 %vm384_vm0, %v374_v43 }
  0x45   : > { %1154 = vmatmul.msk.f32.gmra.mxu1 %vm384_vm0, %v375_v44 }
  0x98   : > { %v408_v12 = vpop.f32.mrf.mxu0 }
  0x99   : > { %v409_v15 = vadd.f32 %v1256_v13, %v408_v12 }
  0x9a   : > { %v453_v49 = vpop.f32.mrf.mxu1 }
  0xa0   : > { %v411_v14 = vpop.f32.mrf.mxu0 }
  0xa1   : > { %v412_v16 = vadd.f32 %v1256_v13, %v411_v14 }
  0xa2   : > { %v456_v51 = vpop.f32.mrf.mxu1 }
  0xa3   : > { %555 = vmatpush.msra.mxu2 %v412_v16  ;;  %v1250_v17 = vpack.i.bf16 %v409_v15, %v412_v16 }
  0xa5   : > { %1251 = vrot.lane.b32.xlu0 %v1250_v17, %s1328_s29  ;;  %556 = vmatpush.msra.mxu2 %v409_v15 }
  0xaa   : > { %v459_v53 = vpop.f32.mrf.mxu1 }
  0xb2   : > { %v462_v56 = vpop.f32.mrf.mxu1 }
  0xba   : > { %v465_v60 = vpop.f32.mrf.mxu1 }
  0xbf   : > { %v592_v27 = vpop.trf.xlu1 }
  0xc2   : > { %v468_v2 = vpop.f32.mrf.mxu1 }
  0xc7   : > { %490 = vxpose.xlu0.b32.start [1/2] (short) (narrow) %v1155_v22, 48  ;;  %v593_v31 = vpop.trf.xlu1 }
  0xcf   : > { %491 = vxpose.xlu0.b32.end [2/2] (short) (narrow) %v1156_v23, 48  ;;  %v594_v34 = vpop.trf.xlu1 }
  0xd7   : > { %v595_v36 = vpop.trf.xlu1 }
  0xdf   : > { %v596_v38 = vpop.trf.xlu1 }
  0xe7   : > { %v597_v41 = vpop.trf.xlu1 }
 0x117   : > { %v1252_v24 = vpop.permute.xlu0 %1251 }
 0x118   : > { %v1253_v25 = vunpack.i.l.bf16 %v1252_v24  ;;  %v1254_v26 = vunpack.i.h.bf16 %v1252_v24 }
 0x11a   : > { %648 = vmatpush.msrb.mxu0 %v1253_v25  ;;  %1203 = vmatpush.msra.mxu3 %v1253_v25 }
 0x11c   : > { %649 = vmatpush.msrb.mxu0 %v1254_v26  ;;  %1204 = vmatpush.msra.mxu3 %v1254_v26 }
 0x11d   : > { %1165 = vmatmul.msk.f32.vlgmr.msrb.gmra.mxu0 %vm522_vm5, %v592_v27  ;;  %1168 = vmatmul.msk.f32.vlgmr.msra.gmra.mxu3 %vm522_vm5, %v595_v36 }
 0x125   : > { %1166 = vmatmul.msk.f32.gmra.mxu0 %vm522_vm5, %v593_v31  ;;  %1169 = vmatmul.msk.f32.gmra.mxu3 %vm522_vm5, %v596_v38 }
 0x12d   : > { %1167 = vmatmul.msk.f32.gmra.mxu0 %vm522_vm5, %v594_v34  ;;  %1170 = vmatmul.msk.f32.gmra.mxu3 %vm522_vm5, %v597_v41 }
 0x16b   : > { %v506_v39 = vpop.trf.xlu0 }
 0x16c   : > { %1159 = vmatmul.msk.f32.vlgmr.msra.gmra.mxu2 %vm522_vm5, %v506_v39 }
 0x173   : > { %v507_v42 = vpop.trf.xlu0 }
 0x174   : > { %1160 = vmatmul.msk.f32.gmra.mxu2 %vm522_vm5, %v507_v42 }
 0x17b   : > { %v508_v45 = vpop.trf.xlu0 }
 0x17c   : > { %1161 = vmatmul.msk.f32.gmra.mxu2 %vm522_vm5, %v508_v45 }
 0x183   : > { %v509_v46 = vpop.trf.xlu0 }
 0x184   : > { %1162 = vmatmul.msk.f32.gmra.mxu2 %vm522_vm5, %v509_v46 }
 0x18b   : > { %v510_v47 = vpop.trf.xlu0 }
 0x18c   : > { %1163 = vmatmul.msk.f32.gmra.mxu2 %vm522_vm5, %v510_v47 }
 0x193   : > { %v511_v48 = vpop.trf.xlu0 }
 0x194   : > { %1164 = vmatmul.msk.f32.gmra.mxu2 %vm522_vm5, %v511_v48 }
 0x19a   : > { %v651_v58 = vpop.f32.mrf.mxu0 }
 0x1a0   : > { %v660_v55 = vpop.f32.mrf.mxu3 }
 0x1a2   : > { %v654_v62 = vpop.f32.mrf.mxu0 }
 0x1a8   : > { %v663_v59 = vpop.f32.mrf.mxu3 }
 0x1aa   : > { %v657_v10 = vpop.f32.mrf.mxu0 }
 0x1b0   : > { %v666_v63 = vpop.f32.mrf.mxu3 }
 0x1ef   : > { %v1512_v50 = vpop.f32.mrf.mxu2 }
 0x1f0   : > { %v669_v22 = vadd.f32 %v651_v58, %v1512_v50 }
 0x1f2   : > { %v675_v26 = vadd.f32 %v669_v22, %v453_v49 }
 0x1f4   : > { %v687_v29 = vmul.f32 0.2, %v675_v26  ;;  %vm681_vm11 = vcmp.gt.f32.partialorder %v675_v26, 0.0 }
 0x1f6   : > { %v693_v31 = vsel %vm681_vm11, %v675_v26, %v687_v29 }
 0x1f7   : > { %v1514_v52 = vpop.f32.mrf.mxu2 }
 0x1f8   : > { %v670_v16 = vadd.f32 %v654_v62, %v1514_v52 }
 0x1fa   : > { %v676_v23 = vadd.f32 %v670_v16, %v456_v51 }
 0x1fc   : > { %v688_v27 = vmul.f32 0.2, %v676_v23  ;;  %vm682_vm10 = vcmp.gt.f32.partialorder %v676_v23, 0.0 }
 0x1fe   : > { %v694_v30 = vsel %vm682_vm10, %v676_v23, %v688_v27 }
 0x1ff   : > { %v1516_v54 = vpop.f32.mrf.mxu2 }
 0x200   : > { %v671_v12 = vadd.f32 %v657_v10, %v1516_v54 }
 0x202   : > { %v677_v17 = vadd.f32 %v671_v12, %v459_v53 }
 0x204   : > { %v689_v24 = vmul.f32 0.2, %v677_v17  ;;  %vm683_vm9 = vcmp.gt.f32.partialorder %v677_v17, 0.0 }
 0x206   : > { %v695_v28 = vsel %vm683_vm9, %v677_v17, %v689_v24 }
 0x207   : > { %v1518_v57 = vpop.f32.mrf.mxu2 }
 0x208   : > { %v672_v4 = vadd.f32 %v660_v55, %v1518_v57 }
 0x20a   : > { %v678_v13 = vadd.f32 %v672_v4, %v462_v56 }
 0x20c   : > { %v690_v18 = vmul.f32 0.2, %v678_v13  ;;  %vm684_vm8 = vcmp.gt.f32.partialorder %v678_v13, 0.0 }
 0x20e   : > { %v696_v25 = vsel %vm684_vm8, %v678_v13, %v690_v18 }
 0x20f   : > { %v1520_v61 = vpop.f32.mrf.mxu2 }
 0x210   : > { %v673_v0 = vadd.f32 %v663_v59, %v1520_v61 }
 0x212   : > { %v679_v5 = vadd.f32 %v673_v0, %v465_v60 }
 0x214   : > { %v691_v14 = vmul.f32 0.2, %v679_v5  ;;  %vm685_vm7 = vcmp.gt.f32.partialorder %v679_v5, 0.0 }
 0x216   : > { %v697_v21 = vsel %vm685_vm7, %v679_v5, %v691_v14  ;;  %v797_v5 = vand.u32 127, %v471_v7  ;;  %vm943_vm7 = vcmask 31744  }
 0x217   : > { %v1523_v1 = vpop.f32.mrf.mxu2 }
 0x218   : > { %v674_v3 = vadd.f32 %v666_v63, %v1523_v1 }
 0x21a   : > { %v680_v6 = vadd.f32 %v674_v3, %v468_v2  ;;  %v1329_v2 = vmov 1.0  }
 0x21b   : > { %1184 = vmatpush.msk.msrb.mxu2 %vm1469_vm2, %v1329_v2 }
 0x21c   : > { %vm686_vm6 = vcmp.gt.f32.partialorder %v680_v6, 0.0  ;;  %v692_v8 = vmul.f32 0.2, %v680_v6 }
 0x21d   : > { %1185 = vmatpush.msk.msrb.mxu2 %vm1457_vm1, %v1329_v2 }
 0x21e   : > { %v698_v15 = vsel %vm686_vm6, %v680_v6, %v692_v8  ;;  %v799_v8 = vadd.s32 4294967288, %v797_v5 }
 0x21f   : > { %1171 = vmatpush.xpose.msk.msra.mxu0 %vm384_vm0, %v698_v15 }
 0x223   : > { %1172 = vmatpush.xpose.msk.msra.mxu0 %vm384_vm0, %v697_v21 }
 0x227   : > { %1173 = vmatpush.xpose.msk.msra.mxu0 %vm384_vm0, %v696_v25 }
 0x22b   : > { %1174 = vmatpush.xpose.msk.msra.mxu0 %vm384_vm0, %v695_v28 }
 0x22f   : > { %1175 = vmatpush.xpose.msk.msra.mxu0 %vm384_vm0, %v694_v30 }
 0x233   : > { %1176 = vmatpush.xpose.msk.msra.mxu0 %vm384_vm0, %v693_v31 }
 0x236   : > { %1177 = vmatmul.msk.f32.vlgmr.msra.gmra.mxu0 %vm384_vm0, %v699_v32  ;;  %v910_v32 = vld [vmem:[%s1644_s7] sm:$0xf] }
 0x237   : > { %1178 = vmatpush.msk.msrb.mxu0 %vm1469_vm2, %v1329_v2 }
 0x239   : > { %1179 = vmatpush.msk.msrb.mxu0 %vm1457_vm1, %v1329_v2 }
 0x23b   : > { %1181 = vmatpush.xpose.msk.msra.mxu0 %vm763_vm12, %v1475_v20 }
 0x23f   : > { %1182 = vmatpush.xpose.msk.msra.mxu0 %vm763_vm12, %v1463_v11 }
 0x2b3   : > { %v1540_v33 = vpop.f32.mrf.mxu0 }
 0x2b4   : > { %v747_v34 = vperm.slane %v1540_v33, 0  ;;  %v742_v35 = vrot.slane %v1540_v33, 1  ;;  %v743_v44 = vrot.slane %v1540_v33, 2  ;;  %v744_v51 = vrot.slane %v1540_v33, 3 }
 0x2b6   : > { %v755_v36 = vsel %vm1457_vm1, %v747_v34, -1e+30  ;;  %v748_v37 = vperm.slane %v742_v35, 0  ;;  %v756_v41 = vsel %vm1469_vm2, %v747_v34, -1e+30  ;;  %v749_v46 = vperm.slane %v743_v44, 0 }
 0x2b7   : > { %v764_v38 = vsel %vm763_vm12, %v755_v36, -inf  ;;  %v767_v42 = vsel %vm763_vm12, %v756_v41, -inf  ;;  %v750_v55 = vperm.slane %v744_v51, 0 }
 0x2b8   : > { %765 = vmax.xlane.f32.xlu2 %v764_v38  ;;  %v757_v39 = vsel %vm1457_vm1, %v748_v37, -1e+30  ;;  %v758_v43 = vsel %vm1469_vm2, %v748_v37, -1e+30  ;;  %v759_v47 = vsel %vm1457_vm1, %v749_v46, -1e+30 }
 0x2b9   : > { %v770_v40 = vsel %vm763_vm12, %v757_v39, -inf  ;;  %v773_v45 = vsel %vm763_vm12, %v758_v43, -inf  ;;  %v776_v48 = vsel %vm763_vm12, %v759_v47, -inf  ;;  %v760_v49 = vsel %vm1469_vm2, %v749_v46, -1e+30 }
 0x2ba   : > { %771 = vmax.xlane.f32.xlu1 %v770_v40  ;;  %v779_v53 = vsel %vm763_vm12, %v760_v49, -inf  ;;  %v761_v56 = vsel %vm1457_vm1, %v750_v55, -1e+30  ;;  %v762_v59 = vsel %vm1469_vm2, %v750_v55, -1e+30  ;;  %vm816_vm1 = vcmask 1043459  }
 0x2bb   : > { %v782_v58 = vsel %vm763_vm12, %v761_v56, -inf  ;;  %v785_v60 = vsel %vm763_vm12, %v762_v59, -inf  ;;  %vm962_vm2 = vcmask 1043456  }
 0x2bc   : > { %1187 = vmatpush.msk.msrb.mxu3 %vm962_vm2, %v910_v32 }
 0x2c0   : > { %768 = vmax.xlane.f32.xlu2 %v767_v42 }
 0x2c8   : > { %774 = vmax.xlane.f32.xlu2 %v773_v45 }
 0x2d0   : > { %777 = vmax.xlane.f32.xlu2 %v776_v48 }
 0x2d8   : > { %780 = vmax.xlane.f32.xlu2 %v779_v53 }
 0x2e0   : > { %783 = vmax.xlane.f32.xlu2 %v782_v58 }
 0x2e8   : > { %786 = vmax.xlane.f32.xlu2 %v785_v60 }
 0x32b   : > { %v766_v62 = vpop.xlane.xlu2 %765 }
 0x32c   : > { %v798_v15 = vperm.slane %v766_v62, %v797_v5 }
 0x32d   : > { %v772_v19 = vpop.xlane.xlu1 %771 }
 0x32e   : > { %v803_v13 = vperm.slane %v772_v19, %v797_v5 }
 0x333   : > { %v769_v63 = vpop.xlane.xlu2 %768 }
 0x334   : > { %v800_v14 = vperm.slane %v769_v63, %v799_v8 }
 0x336   : > { %v802_v21 = vsel %vm801_vm13, %v800_v14, %v798_v15 }
 0x33b   : > { %v775_v0 = vpop.xlane.xlu2 %774 }
 0x33c   : > { %v804_v10 = vperm.slane %v775_v0, %v799_v8 }
 0x33e   : > { %v805_v16 = vsel %vm801_vm13, %v804_v10, %v803_v13 }
 0x33f   : > { %v813_v7 = vsel %vm812_vm14, %v805_v16, %v802_v21 }
 0x343   : > { %v778_v3 = vpop.xlane.xlu2 %777 }
 0x344   : > { %v806_v9 = vperm.slane %v778_v3, %v797_v5 }
 0x34b   : > { %v781_v4 = vpop.xlane.xlu2 %780 }
 0x34c   : > { %v807_v12 = vperm.slane %v781_v4, %v799_v8 }
 0x34e   : > { %v808_v17 = vsel %vm801_vm13, %v807_v12, %v806_v9 }
 0x34f   : > { %v815_v24 = vsel %vm814_vm15, %v808_v17, %v813_v7 }
 0x353   : > { %v784_v6 = vpop.xlane.xlu2 %783 }
 0x354   : > { %v809_v22 = vperm.slane %v784_v6, %v797_v5 }
 0x35b   : > { %v787_v18 = vpop.xlane.xlu2 %786 }
 0x35c   : > { %v810_v23 = vperm.slane %v787_v18, %v799_v8 }
 0x35e   : > { %v811_v25 = vsel %vm801_vm13, %v810_v23, %v809_v22 }
 0x35f   : > { %v817_v26 = vsel %vm816_vm1, %v811_v25, %v815_v24 }
 0x360   : > { %1180 = vmatmul.msk.f32.vlgmr.msrb.gmra.mxu0 %vm522_vm5, %v817_v26 }
 0x3dd   : > { %v837_v27 = vpop.f32.mrf.mxu0 }
 0x3de   : > { %v840_v28 = vsub.f32 %v1540_v33, %v837_v27 }
 0x3e0   : > { %v841_v29 = vmul.f32 1.442695, %v840_v28 }
 0x3e2   : > { %1259 = vpow2.f32 %v841_v29 }
 0x3e8   : > { %v1260_v30 = vpop.eup %1259 }
 0x3e9   : > { %1183 = vmatmul.msk.f32.vlgmr.msra.gmra.mxu0 %vm763_vm12, %v1260_v30 }
 0x466   : > { %v869_v31 = vpop.f32.mrf.mxu0 }
 0x467   : > { %1186 = vmatmul.msk.f32.vlgmr.msrb.gmra.mxu2 %vm522_vm5, %v869_v31 }
 0x4ea   : > { %v892_v34 = vpop.f32.mrf.mxu2 }
 0x4eb   : > { %1261 = vrcp.f32 %v892_v34  ;;  %v906_v33 = vand.u32 2147483648, %v892_v34  ;;  %v904_v39 = vand.u32 2147483647, %v892_v34  ;;  %vm900_vm4 = vweird.f32 %v892_v34 }
 0x4ed   : > { %v907_v41 = vor.u32 1.1754944e-38, %v906_v33  ;;  %vm905_vm5 = vcmp.eq.f32.partialorder %v904_v39, 8.507059e+37 }
 0x4f1   : > { %v1262_v35 = vpop.eup %1261 }
 0x4f2   : > { %v896_v36 = vmul.f32 %v1262_v35, %v892_v34  ;;  %vm901_vm3 = vweird.f32 %v1262_v35 }
 0x4f3   : > { %vm902_vm6 = vmor %vm900_vm4, %vm901_vm3 }
 0x4f4   : > { %v897_v37 = vsub.f32 1.0, %v896_v36 }
 0x4f6   : > { %v898_v38 = vmul.f32 %v1262_v35, %v897_v37 }
 0x4f8   : > { %v899_v40 = vadd.f32 %v1262_v35, %v898_v38 }
 0x4fa   : > { %v903_v42 = vsel %vm902_vm6, %v1262_v35, %v899_v40 }
 0x4fb   : > { %v908_v43 = vsel %vm905_vm5, %v907_v41, %v903_v42 }
 0x4fc   : > { %v909_v44 = vmul.f32 %v1260_v30, %v908_v43 }
 0x4fe   : > { %911 = vxpose.xlu0.b32.start.end [1/1] (short) (narrow) %v909_v44, 48 }
 0x5a2   : > { %v927_v45 = vpop.trf.xlu0 }
 0x5a3   : > { %1188 = vmatmul.msk.f32.vlgmr.msrb.gmra.mxu3 %vm943_vm7, %v927_v45 }
 0x5aa   : > { %v928_v46 = vpop.trf.xlu0 }
 0x5ab   : > { %1189 = vmatmul.msk.f32.gmra.mxu3 %vm943_vm7, %v928_v46 }
 0x5b2   : > { %v929_v47 = vpop.trf.xlu0 }
 0x5b3   : > { %1190 = vmatmul.msk.f32.gmra.mxu3 %vm943_vm7, %v929_v47 }
 0x5ba   : > { %v930_v48 = vpop.trf.xlu0 }
 0x5bb   : > { %1191 = vmatmul.msk.f32.gmra.mxu3 %vm943_vm7, %v930_v48 }
 0x5c2   : > { %v931_v49 = vpop.trf.xlu0 }
 0x5c3   : > { %1192 = vmatmul.msk.f32.gmra.mxu3 %vm943_vm7, %v931_v49 }
 0x5ca   : > { %v932_v51 = vpop.trf.xlu0 }
 0x5cb   : > { %1193 = vmatmul.msk.f32.gmra.mxu3 %vm943_vm7, %v932_v51 }
 0x626   : > { %v983_v53 = vpop.f32.mrf.mxu3 }
 0x627   : > { %v1001_v4 = vmul.f32 %v983_v53, %v1512_v50 }
 0x62e   : > { %v986_v55 = vpop.f32.mrf.mxu3 }
 0x62f   : > { %v1002_v3 = vmul.f32 %v986_v55, %v1514_v52 }
 0x636   : > { %v989_v56 = vpop.f32.mrf.mxu3 }
 0x637   : > { %v1003_v2 = vmul.f32 %v989_v56, %v1516_v54  ;;  %v1258_v54 = vld [vmem:[%s1645_s8] ss:$0 sm:$0xff] }
 0x63e   : > { %v992_v58 = vpop.f32.mrf.mxu3 }
 0x63f   : > { %v1004_v0 = vmul.f32 %v992_v58, %v1518_v57 }
 0x646   : > { %v995_v59 = vpop.f32.mrf.mxu3 }
 0x647   : > { %v1005_v63 = vmul.f32 %v995_v59, %v1520_v61 }
 0x64e   : > { %v998_v60 = vpop.f32.mrf.mxu3 }
 0x64f   : > { %v1006_v62 = vmul.f32 %v998_v60, %v1523_v1 }
 0x651   : > { %1021 = vmatpush.msrb.mxu1 %v1006_v62 }
 0x653   : > { %1022 = vmatpush.msrb.mxu1 %v1005_v63 }
 0x655   : > { %1023 = vmatpush.msrb.mxu1 %v1004_v0 }
 0x657   : > { %1024 = vmatpush.msrb.mxu1 %v1003_v2 }
 0x659   : > { %1025 = vmatpush.msrb.mxu1 %v1002_v3 }
 0x65b   : > { %1026 = vmatpush.msrb.mxu1 %v1001_v4 }
 0x65c   : > { %1194 = vmatmul.msk.f32.vlgmr.msrb.gmra.mxu1 %vm763_vm12, %v1463_v11 }
 0x664   : > { %1195 = vmatmul.msk.f32.gmra.mxu1 %vm763_vm12, %v1475_v20 }
 0x6d9   : > { %v1028_v57 = vpop.f32.mrf.mxu1 }
 0x6da   : > { %v1029_v52 = vadd.f32 %v1258_v54, %v1028_v57 }
 0x6dc   : > { %1034 = vst.msk [vmem:[%s353_s28] sm:$0xff] %vm384_vm0, %v1029_v52 }
 0x6e1   : > { %v1031_v11 = vpop.f32.mrf.mxu1 }
 0x6e2   : > { %v1032_v20 = vadd.f32 %v1258_v54, %v1031_v11 }
 0x6e4   : > { %1035 = vst.msk [vmem:[%s353_s28 + $0x8] sm:$0xff] %vm384_vm0, %v1032_v20 }
 0x6e5   : > { %1290 = shalt.err (!%p1287_p3)
}
 0x6e6   : > { %s1330_s22 = smov 128   ;;  %s1331_s28 = smov 8  }
 0x6e7   : > { %1206 = dma.vmem_to_hbm [thread:$0]  (%p1420_p5), %s1050_s16, 256, %s1052_s17, %s1037_s21, %s1330_s22, %s1330_s22, %s1331_s28  }
 0x6e8 PF: > { %p1212_p4 = scmp.ge.s32.totalorder %s1325_s12, 2  ;;  %s1066_s27 = sand.u32 1, %s1313_s30  }
 0x6e9   : > { %s1067_s23 = scalar_lea.sflag [#allocation3], %s1066_s27 }
 0x6ea   : > { %p1209_p7 = pnand %p1212_p4, %p1424_p6 }
 0x6ec   : > { %p1210_p8 = pneg %p1209_p7 }
 0x6ee   : > { %1308 = dma.done.wait (%p1210_p8), %s1067_s23, 256  }
 0x6ef   : > { %1310 = vsyncadd (%p1210_p8), %s1067_s23, 4294967040  ;;  %p19_p9 = scmp.ge.s32.totalorder %s1407_s15, 6   ;;  %s1653_s30 = smov %s1317_s10 }
 0x6f0   : > { %s1654_s10 = smov %s1321_s11  ;;  %s1655_s11 = smov %s1418_s18 }
 0x6f1   : > { %s1656_s12 = smov %s1407_s15  ;;  %21 = sbr.rel (!%p19_p9) target bundleno = 3 (0x3), region = 97 }
 0x6f6   :  { %1073 = vsyncpa [#allocation3], 1 }
 0x6f7   :  { %1075 = vsyncpa [#allocation3 + $0x1], 1 }

</bundles_post_ra>
